<compile_context>
chip_gen: v7x
topology: tpu7x:2x2x1
jax: 0.10.0
libtpu: 0.0.40
codegen_flags: <defaults>
</compile_context>

<pallas_src>
import functools
import math

import jax
import jax.numpy as jnp
from jax.experimental import pallas as pl
from jax.experimental.pallas import tpu as pltpu


_SQRT_2_OVER_PI = 0.7978845608028654
_LANE = 128
_SUBLANE = 8


def _gelu_tanh(x):
    # TODO(synk): torch nn.GELU() defaults to the exact erf form; Mosaic has no
    # guaranteed erf lowering, so kernel AND reference use the tanh
    # approximation (== nn.GELU(approximate='tanh')), ~1e-3 deviation.
    return 0.5 * x * (1.0 + jnp.tanh(_SQRT_2_OVER_PI * (x + 0.044715 * (x * x * x))))


def _round_up(n, m):
    return ((n + m - 1) // m) * m


def _mlp_kernel(x_ref, w1_ref, b1_ref, w2_ref, b2_ref, o_ref):
    """One (tm, Ep) token tile through both LoRA-merged projections + GELU.

    MXU operands stay in their native dtype (bf16-friendly); accumulation and
    the bias/GELU epilogue are in f32.
    """
    x = x_ref[...].astype(w1_ref.dtype)            # no-op when dtypes match
    h = jnp.dot(x, w1_ref[...], preferred_element_type=jnp.float32)      # (tm, Fp)
    h = _gelu_tanh(h + b1_ref[...].astype(jnp.float32))
    y = jnp.dot(h.astype(w2_ref.dtype), w2_ref[...],
                preferred_element_type=jnp.float32)                      # (tm, Ep)
    y = y + b2_ref[...].astype(jnp.float32)
    o_ref[...] = y.astype(o_ref.dtype)


def prepare_lora_mlp_params(w1, b1, lora_a1, lora_b1, w2, b2, lora_a2, lora_b2,
                            *, scaling1, scaling2, param_dtype=None):
    """One-time (weight-stationary) preparation.

    PyTorch layouts:
      w1: (F, E)  b1: (F,)  lora_a1: (r, E)  lora_b1: (F, r)
      w2: (E, F)  b2: (E,)  lora_a2: (r, F)  lora_b2: (E, r)

    Folds LoRA exactly into the base weight (W_eff = W + s * B @ A), transposes
    to (in, out) so the kernel's lane (last) dim is the output features, and
    zero-pads feature dims to multiples of 128 for unmasked lane-dense stores.
    Call once; reuse across forward calls.
    """
    hp = jax.lax.Precision.HIGHEST
    F, E = w1.shape

    w1t = w1.T + scaling1 * jnp.dot(lora_a1.T, lora_b1.T, precision=hp)   # (E, F)
    w2t = w2.T + scaling2 * jnp.dot(lora_a2.T, lora_b2.T, precision=hp)   # (F, E)

    if param_dtype is not None:
        w1t = w1t.astype(param_dtype)
        w2t = w2t.astype(param_dtype)

    ep = _round_up(E, _LANE)
    fp = _round_up(F, _LANE)
    if (ep, fp) != (E, F):
        w1t = jnp.pad(w1t, ((0, ep - E), (0, fp - F)))
        w2t = jnp.pad(w2t, ((0, fp - F), (0, ep - E)))
        b1 = jnp.pad(b1, (0, fp - F))
        b2 = jnp.pad(b2, (0, ep - E))

    return dict(w1t=w1t, b1=b1.reshape(1, fp), w2t=w2t, b2=b2.reshape(1, ep), e=E)


def lora_mlp_forward(x, params, *, tm=256):
    """Fused forward: x (..., E) -> (..., E) using prepared params."""
    E = params["e"]
    w1t, b1 = params["w1t"], params["b1"]
    w2t, b2 = params["w2t"], params["b2"]
    ep, fp = w1t.shape

    orig_shape = x.shape
    assert orig_shape[-1] == E, (orig_shape, E)
    M = math.prod(orig_shape[:-1])
    x2 = x.reshape(M, E)
    if ep != E:
        x2 = jnp.pad(x2, ((0, 0), (0, ep - E)))

    # Token tile: multiple of 8 (sublane); force >= 2 grid steps whenever M
    # allows so the "parallel" axis can shard across v7x's 2 TensorCores.
    if M % _SUBLANE != 0:
        tm = M                                     # whole axis == full dim (legal)
    else:
        tm = max(_SUBLANE, (min(tm, M) // _SUBLANE) * _SUBLANE)
        if pl.cdiv(M, tm) < 2 and M >= 2 * _SUBLANE:
            tm = _round_up((M + 1) // 2, _SUBLANE)
    grid_m = pl.cdiv(M, tm)

    # VMEM budget: resident weights (worst case double-buffered) + streamed
    # x/out tiles + f32 hidden temp + compiler scratch headroom, clamped to the
    # chip's capacity minus headroom.
    w_bytes = (2 * ep * fp + ep + fp) * jnp.dtype(w1t.dtype).itemsize
    act_bytes = 2 * 2 * tm * ep * jnp.dtype(x.dtype).itemsize
    hid_bytes = tm * fp * 4
    est = 2 * w_bytes + act_bytes + hid_bytes + (8 << 20)
    try:
        vmem_cap = int(pltpu.get_tpu_info().vmem_capacity_bytes)
    except Exception:
        vmem_cap = 64 << 20
    vmem_limit = int(min(max(est, 32 << 20), vmem_cap - (8 << 20)))

    def call(weight_buffer_count):
        const = lambda i: (0, 0)
        if weight_buffer_count == 1:
            # Constant index_map => DMA'd once; single buffer halves weight VMEM.
            wspec = functools.partial(pl.BlockSpec, index_map=const,
                                      pipeline_mode=pl.Buffered(1))
        else:
            wspec = functools.partial(pl.BlockSpec, index_map=const)
        return pl.pallas_call(
            _mlp_kernel,
            out_shape=jax.ShapeDtypeStruct((M, ep), x.dtype),
            grid_spec=pltpu.PrefetchScalarGridSpec(
                num_scalar_prefetch=0,
                grid=(grid_m,),
                in_specs=[
                    pl.BlockSpec((tm, ep), lambda i: (i, 0)),   # x tile (streamed)
                    wspec((ep, fp)),                            # merged W1^T (resident)
                    wspec((1, fp)),                             # b1
                    wspec((fp, ep)),                            # merged W2^T (resident)
                    wspec((1, ep)),                             # b2
                ],
                out_specs=pl.BlockSpec((tm, ep), lambda i: (i, 0)),
            ),
            compiler_params=pltpu.CompilerParams(
                dimension_semantics=("parallel",),
                vmem_limit_bytes=vmem_limit,
            ),
        )(x2, w1t, b1, w2t, b2)

    try:
        out = call(1)
    except Exception:
        # TODO(synk): this Pallas version rejected pl.Buffered(1); fall back to
        # the default double-buffered constant-index specs.
        out = call(2)

    if ep != E:
        out = out[:, :E]
    return out.reshape(orig_shape)


def lora_mlp_block(x, w1, b1, lora_a1, lora_b1, w2, b2, lora_a2, lora_b2,
                   *, scaling1, scaling2, tm=256, param_dtype=None):
    """Convenience one-shot wrapper (prepare + forward)."""
    params = prepare_lora_mlp_params(
        w1, b1, lora_a1, lora_b1, w2, b2, lora_a2, lora_b2,
        scaling1=scaling1, scaling2=scaling2, param_dtype=param_dtype)
    return lora_mlp_forward(x, params, tm=tm)


def lora_mlp_ref(x, w1, b1, a1, bb1, w2, b2, a2, bb2, scaling1, scaling2):
    """Pure-JAX reference (un-merged two-matmul LoRA form, high precision)."""
    hp = jax.lax.Precision.HIGHEST

    def lora_linear(t, w, b, a, bm, s):
        base = jnp.dot(t, w.T, precision=hp) + b
        low = jnp.dot(jnp.dot(t, a.T, precision=hp), bm.T, precision=hp) * s
        return base + low

    h = _gelu_tanh(lora_linear(x, w1, b1, a1, bb1, scaling1))
    return lora_linear(h, w2, b2, a2, bb2, scaling2)


if __name__ == "__main__":
    # Small shapes consistent with the module: batch=2, seq=8, embed=32, mlp=64, r=4.
    B, N = 2, 8
    E, F, R = 32, 64, 4
    ALPHA = 8.0
    scaling = ALPHA / R

    key = jax.random.PRNGKey(0)
    ks = jax.random.split(key, 9)
    x = jax.random.normal(ks[0], (B, N, E), dtype=jnp.float32)

    w1 = jax.random.normal(ks[1], (F, E), dtype=jnp.float32) / math.sqrt(E)
    b1 = jax.random.normal(ks[2], (F,), dtype=jnp.float32) * 0.1
    a1 = jax.random.normal(ks[3], (R, E), dtype=jnp.float32) / math.sqrt(E)
    # loralib inits lora_B to zeros; use non-zero values to exercise the LoRA path.
    bb1 = jax.random.normal(ks[4], (F, R), dtype=jnp.float32) * 0.1

    w2 = jax.random.normal(ks[5], (E, F), dtype=jnp.float32) / math.sqrt(F)
    b2 = jax.random.normal(ks[6], (E,), dtype=jnp.float32) * 0.1
    a2 = jax.random.normal(ks[7], (R, F), dtype=jnp.float32) / math.sqrt(F)
    bb2 = jax.random.normal(ks[8], (E, R), dtype=jnp.float32) * 0.1

    # Prepare once (weight-stationary), then run the fused forward.
    params = prepare_lora_mlp_params(w1, b1, a1, bb1, w2, b2, a2, bb2,
                                     scaling1=scaling, scaling2=scaling)
    out = lora_mlp_forward(x, params)
    out = jax.block_until_ready(out)

    ref = lora_mlp_ref(x, w1, b1, a1, bb1, w2, b2, a2, bb2, scaling, scaling)

    assert out.shape == (B, N, E)
    max_err = float(jnp.max(jnp.abs(out - ref)))
    assert jnp.allclose(out, ref, atol=2e-2, rtol=2e-2), max_err

    print("KERNEL_OK")
</pallas_src>

<mosaic_0001>
module attributes {stable_mosaic.version = 11 : i64} {
  func.func @_mlp_kernel(%arg0: i32, %arg1: memref<8x128xf32, #tpu.memory_space<vmem>>, %arg2: memref<128x128xf32, #tpu.memory_space<vmem>>, %arg3: memref<1x128xf32, #tpu.memory_space<vmem>>, %arg4: memref<128x128xf32, #tpu.memory_space<vmem>>, %arg5: memref<1x128xf32, #tpu.memory_space<vmem>>, %arg6: memref<8x128xf32, #tpu.memory_space<vmem>>) attributes {dimension_semantics = [#tpu.dimension_semantics<parallel>], iteration_bounds = array<i64: 2>, scalar_prefetch = 0 : i64, scratch_operands = 0 : i64, tpu.core_type = #tpu.core_type<tc>, window_params = [{transform_indices = @transform_0, window_bounds = array<i64: 8, 128>}, {pipeline_mode = #tpu.pipeline_mode<synchronous>, transform_indices = @transform_1, window_bounds = array<i64: 128, 128>}, {pipeline_mode = #tpu.pipeline_mode<synchronous>, transform_indices = @transform_2, window_bounds = array<i64: 1, 128>}, {pipeline_mode = #tpu.pipeline_mode<synchronous>, transform_indices = @transform_3, window_bounds = array<i64: 128, 128>}, {pipeline_mode = #tpu.pipeline_mode<synchronous>, transform_indices = @transform_4, window_bounds = array<i64: 1, 128>}, {transform_indices = @transform_5, window_bounds = array<i64: 8, 128>}]} {
    %c0 = arith.constant 0 : index
    %c0_0 = arith.constant 0 : index
    %0 = vector.load %arg1[%c0, %c0_0] : memref<8x128xf32, #tpu.memory_space<vmem>>, vector<8x128xf32>
    %c0_1 = arith.constant 0 : index
    %c0_2 = arith.constant 0 : index
    %1 = vector.load %arg2[%c0_1, %c0_2] : memref<128x128xf32, #tpu.memory_space<vmem>>, vector<128x128xf32>
    %cst = arith.constant dense<0.000000e+00> : vector<8x128xf32>
    %2 = tpu.matmul %0, %1, %cst {dimension_numbers = #tpu.dot_dimension_numbers<[1], [0], [0], [1], [0, 0, 1, 1], [], []>} : vector<8x128xf32>, vector<128x128xf32>, vector<8x128xf32> -> vector<8x128xf32>
    %c0_3 = arith.constant 0 : index
    %c0_4 = arith.constant 0 : index
    %3 = vector.load %arg3[%c0_3, %c0_4] : memref<1x128xf32, #tpu.memory_space<vmem>>, vector<1x128xf32>
    %4 = vector.broadcast %3 : vector<1x128xf32> to vector<8x128xf32>
    %5 = arith.addf %2, %4 : vector<8x128xf32>
    %cst_5 = arith.constant 5.000000e-01 : f32
    %6 = vector.broadcast %cst_5 : f32 to vector<8x128xf32>
    %7 = arith.mulf %6, %5 : vector<8x128xf32>
    %8 = arith.mulf %5, %5 : vector<8x128xf32>
    %9 = arith.mulf %8, %5 : vector<8x128xf32>
    %cst_6 = arith.constant 4.471500e-02 : f32
    %10 = vector.broadcast %cst_6 : f32 to vector<8x128xf32>
    %11 = arith.mulf %10, %9 : vector<8x128xf32>
    %12 = arith.addf %5, %11 : vector<8x128xf32>
    %cst_7 = arith.constant 0.797884583 : f32
    %13 = vector.broadcast %cst_7 : f32 to vector<8x128xf32>
    %14 = arith.mulf %13, %12 : vector<8x128xf32>
    %15 = math.tanh %14 : vector<8x128xf32>
    %cst_8 = arith.constant 1.000000e+00 : f32
    %16 = vector.broadcast %cst_8 : f32 to vector<8x128xf32>
    %17 = arith.addf %16, %15 : vector<8x128xf32>
    %18 = arith.mulf %7, %17 : vector<8x128xf32>
    %c0_9 = arith.constant 0 : index
    %c0_10 = arith.constant 0 : index
    %19 = vector.load %arg4[%c0_9, %c0_10] : memref<128x128xf32, #tpu.memory_space<vmem>>, vector<128x128xf32>
    %cst_11 = arith.constant dense<0.000000e+00> : vector<8x128xf32>
    %20 = tpu.matmul %18, %19, %cst_11 {dimension_numbers = #tpu.dot_dimension_numbers<[1], [0], [0], [1], [0, 0, 1, 1], [], []>} : vector<8x128xf32>, vector<128x128xf32>, vector<8x128xf32> -> vector<8x128xf32>
    %c0_12 = arith.constant 0 : index
    %c0_13 = arith.constant 0 : index
    %21 = vector.load %arg5[%c0_12, %c0_13] : memref<1x128xf32, #tpu.memory_space<vmem>>, vector<1x128xf32>
    %22 = vector.broadcast %21 : vector<1x128xf32> to vector<8x128xf32>
    %23 = arith.addf %20, %22 : vector<8x128xf32>
    %c0_14 = arith.constant 0 : index
    %c0_15 = arith.constant 0 : index
    %24 = vector.load %arg6[%c0_14, %c0_15] : memref<8x128xf32, #tpu.memory_space<vmem>>, vector<8x128xf32>
    tpu.vector_store %arg6[%c0_14, %c0_15], %23 {strides = array<i32>} : memref<8x128xf32, #tpu.memory_space<vmem>>, vector<8x128xf32>,
    return
  }
  func.func @transform_0(%arg0: i32) -> (i32, i32) {
    %c0_i32 = arith.constant 0 : i32
    %c0_i32_0 = arith.constant 0 : i32
    return %arg0, %c0_i32 : i32, i32
  }
  func.func @transform_1(%arg0: i32) -> (i32, i32) {
    %c0_i32 = arith.constant 0 : i32
    %c0_i32_0 = arith.constant 0 : i32
    %c0_i32_1 = arith.constant 0 : i32
    return %c0_i32, %c0_i32_0 : i32, i32
  }
  func.func @transform_2(%arg0: i32) -> (i32, i32) {
    %c0_i32 = arith.constant 0 : i32
    %c0_i32_0 = arith.constant 0 : i32
    %c0_i32_1 = arith.constant 0 : i32
    return %c0_i32, %c0_i32_0 : i32, i32
  }
  func.func @transform_3(%arg0: i32) -> (i32, i32) {
    %c0_i32 = arith.constant 0 : i32
    %c0_i32_0 = arith.constant 0 : i32
    %c0_i32_1 = arith.constant 0 : i32
    return %c0_i32, %c0_i32_0 : i32, i32
  }
  func.func @transform_4(%arg0: i32) -> (i32, i32) {
    %c0_i32 = arith.constant 0 : i32
    %c0_i32_0 = arith.constant 0 : i32
    %c0_i32_1 = arith.constant 0 : i32
    return %c0_i32, %c0_i32_0 : i32, i32
  }
  func.func @transform_5(%arg0: i32) -> (i32, i32) {
    %c0_i32 = arith.constant 0 : i32
    %c0_i32_0 = arith.constant 0 : i32
    return %arg0, %c0_i32 : i32, i32
  }
}

module attributes {stable_mosaic.version = 11 : i64} {
  func.func @_mlp_kernel(%arg0: i32, %arg1: memref<8x128xf32, #tpu.memory_space<vmem>>, %arg2: memref<128x128xf32, #tpu.memory_space<vmem>>, %arg3: memref<1x128xf32, #tpu.memory_space<vmem>>, %arg4: memref<128x128xf32, #tpu.memory_space<vmem>>, %arg5: memref<1x128xf32, #tpu.memory_space<vmem>>, %arg6: memref<8x128xf32, #tpu.memory_space<vmem>>) attributes {dimension_semantics = [#tpu.dimension_semantics<parallel>], iteration_bounds = array<i64: 2>, scalar_prefetch = 0 : i64, scratch_operands = 0 : i64, tpu.core_type = #tpu.core_type<tc>, window_params = [{transform_indices = @transform_0, window_bounds = array<i64: 8, 128>}, {pipeline_mode = #tpu.pipeline_mode<synchronous>, transform_indices = @transform_1, window_bounds = array<i64: 128, 128>}, {pipeline_mode = #tpu.pipeline_mode<synchronous>, transform_indices = @transform_2, window_bounds = array<i64: 1, 128>}, {pipeline_mode = #tpu.pipeline_mode<synchronous>, transform_indices = @transform_3, window_bounds = array<i64: 128, 128>}, {pipeline_mode = #tpu.pipeline_mode<synchronous>, transform_indices = @transform_4, window_bounds = array<i64: 1, 128>}, {transform_indices = @transform_5, window_bounds = array<i64: 8, 128>}]} {
    %c0 = arith.constant 0 : index
    %c0_0 = arith.constant 0 : index
    %0 = vector.load %arg1[%c0, %c0_0] : memref<8x128xf32, #tpu.memory_space<vmem>>, vector<8x128xf32>
    %c0_1 = arith.constant 0 : index
    %c0_2 = arith.constant 0 : index
    %1 = vector.load %arg2[%c0_1, %c0_2] : memref<128x128xf32, #tpu.memory_space<vmem>>, vector<128x128xf32>
    %cst = arith.constant dense<0.000000e+00> : vector<8x128xf32>
    %2 = tpu.matmul %0, %1, %cst {dimension_numbers = #tpu.dot_dimension_numbers<[1], [0], [0], [1], [0, 0, 1, 1], [], []>} : vector<8x128xf32>, vector<128x128xf32>, vector<8x128xf32> -> vector<8x128xf32>
    %c0_3 = arith.constant 0 : index
    %c0_4 = arith.constant 0 : index
    %3 = vector.load %arg3[%c0_3, %c0_4] : memref<1x128xf32, #tpu.memory_space<vmem>>, vector<1x128xf32>
    %4 = vector.broadcast %3 : vector<1x128xf32> to vector<8x128xf32>
    %5 = arith.addf %2, %4 : vector<8x128xf32>
    %cst_5 = arith.constant 5.000000e-01 : f32
    %6 = vector.broadcast %cst_5 : f32 to vector<8x128xf32>
    %7 = arith.mulf %6, %5 : vector<8x128xf32>
    %8 = arith.mulf %5, %5 : vector<8x128xf32>
    %9 = arith.mulf %8, %5 : vector<8x128xf32>
    %cst_6 = arith.constant 4.471500e-02 : f32
    %10 = vector.broadcast %cst_6 : f32 to vector<8x128xf32>
    %11 = arith.mulf %10, %9 : vector<8x128xf32>
    %12 = arith.addf %5, %11 : vector<8x128xf32>
    %cst_7 = arith.constant 0.797884583 : f32
    %13 = vector.broadcast %cst_7 : f32 to vector<8x128xf32>
    %14 = arith.mulf %13, %12 : vector<8x128xf32>
    %15 = math.tanh %14 : vector<8x128xf32>
    %cst_8 = arith.constant 1.000000e+00 : f32
    %16 = vector.broadcast %cst_8 : f32 to vector<8x128xf32>
    %17 = arith.addf %16, %15 : vector<8x128xf32>
    %18 = arith.mulf %7, %17 : vector<8x128xf32>
    %c0_9 = arith.constant 0 : index
    %c0_10 = arith.constant 0 : index
    %19 = vector.load %arg4[%c0_9, %c0_10] : memref<128x128xf32, #tpu.memory_space<vmem>>, vector<128x128xf32>
    %cst_11 = arith.constant dense<0.000000e+00> : vector<8x128xf32>
    %20 = tpu.matmul %18, %19, %cst_11 {dimension_numbers = #tpu.dot_dimension_numbers<[1], [0], [0], [1], [0, 0, 1, 1], [], []>} : vector<8x128xf32>, vector<128x128xf32>, vector<8x128xf32> -> vector<8x128xf32>
    %c0_12 = arith.constant 0 : index
    %c0_13 = arith.constant 0 : index
    %21 = vector.load %arg5[%c0_12, %c0_13] : memref<1x128xf32, #tpu.memory_space<vmem>>, vector<1x128xf32>
    %22 = vector.broadcast %21 : vector<1x128xf32> to vector<8x128xf32>
    %23 = arith.addf %20, %22 : vector<8x128xf32>
    %c0_14 = arith.constant 0 : index
    %c0_15 = arith.constant 0 : index
    %24 = vector.load %arg6[%c0_14, %c0_15] : memref<8x128xf32, #tpu.memory_space<vmem>>, vector<8x128xf32>
    tpu.vector_store %arg6[%c0_14, %c0_15], %23 {strides = array<i32>} : memref<8x128xf32, #tpu.memory_space<vmem>>, vector<8x128xf32>,
    return
  }
  func.func @transform_0(%arg0: i32) -> (i32, i32) {
    %c0_i32 = arith.constant 0 : i32
    %c0_i32_0 = arith.constant 0 : i32
    return %arg0, %c0_i32 : i32, i32
  }
  func.func @transform_1(%arg0: i32) -> (i32, i32) {
    %c0_i32 = arith.constant 0 : i32
    %c0_i32_0 = arith.constant 0 : i32
    %c0_i32_1 = arith.constant 0 : i32
    return %c0_i32, %c0_i32_0 : i32, i32
  }
  func.func @transform_2(%arg0: i32) -> (i32, i32) {
    %c0_i32 = arith.constant 0 : i32
    %c0_i32_0 = arith.constant 0 : i32
    %c0_i32_1 = arith.constant 0 : i32
    return %c0_i32, %c0_i32_0 : i32, i32
  }
  func.func @transform_3(%arg0: i32) -> (i32, i32) {
    %c0_i32 = arith.constant 0 : i32
    %c0_i32_0 = arith.constant 0 : i32
    %c0_i32_1 = arith.constant 0 : i32
    return %c0_i32, %c0_i32_0 : i32, i32
  }
  func.func @transform_4(%arg0: i32) -> (i32, i32) {
    %c0_i32 = arith.constant 0 : i32
    %c0_i32_0 = arith.constant 0 : i32
    %c0_i32_1 = arith.constant 0 : i32
    return %c0_i32, %c0_i32_0 : i32, i32
  }
  func.func @transform_5(%arg0: i32) -> (i32, i32) {
    %c0_i32 = arith.constant 0 : i32
    %c0_i32_0 = arith.constant 0 : i32
    return %arg0, %c0_i32 : i32, i32
  }
}

</mosaic_0001>

<bundles_post_ra>
// kernel: tpu_custom_call.1
= control target key start
LH: loop header
LB: loop body
LE: loop exit
PB: predicated region body
PF: predicated region fallthrough
CT: control target
= control target key end

     0   :  { %10 = vsyncpa [#allocation3], 0  ;;  %s1268_s0 = inlined_call_operand.hbm [shape: f32[16,128], index: 0, kind: input, shape index: {}]   ;;  %s1269_s1 = inlined_call_operand.hbm [shape: f32[128,128], index: 1, kind: input, shape index: {}]   ;;  %s1270_s2 = inlined_call_operand.vmem [shape: f32[1,128], index: 2, kind: input, shape index: {}]   ;;  %s1271_s3 = inlined_call_operand.hbm [shape: f32[128,128], index: 3, kind: input, shape index: {}]   ;;  %s1272_s4 = inlined_call_operand.vmem [shape: f32[1,128], index: 4, kind: input, shape index: {}]   ;;  %s1273_s5 = inlined_call_operand.hbm [shape: f32[16,128], index: 5, kind: output, shape index: {}]  }
   0x1   :  { %12 = vsyncpa [#allocation3 + $0x1], 0 }
   0x2   :  { %13 = vsyncpa [#allocation6], 0 }
   0x3   :  { %14 = vsyncpa [#allocation4], 0 }
   0x4   :  { %16 = vsyncpa [#allocation4 + $0x1], 0  ;;  %s1010_s18 = smov 0   ;;  %s1012_s19 = smov 0  }
   0x5   :  { %s1014_s20 = smov 0   ;;  %s1016_s21 = smov 0  }
   0x6 LB: > { %s1031_s22 = sadd.s32 4294967295, %s969_s21   ;;  %s569_s23 = sadd.s32 4294967294, %s969_s21   ;;  %s969_s21 = sphi %s1016_s21, %s1293_s21   ;;  %s965_s20 = sphi %s1014_s20, %s1292_s20   ;;  %s961_s19 = sphi %s1012_s19, %s1291_s19   ;;  %s957_s18 = sphi %s1010_s18, %s1290_s18  }
   0x7   : > { %p42_p0 = scmp.ne.s32.totalorder %s961_s19, %s957_s18  ;;  %p1274_p1 = scmp.eq.s32.totalorder %s1031_s22, 0 }
   0x8   : > { %p156_p3 = scmp.eq.s32.totalorder %s569_s23, 1  ;;  %p570_p5 = scmp.ge.s32.totalorder %s969_s21, 1 }
   0x9   : > { %p1040_p4 = por %p1274_p1, %p42_p0  ;;  %p163_p7 = scmp.lt.s32.totalorder %s969_s21, 3 }
   0xa   : > { %p1045_p6 = por %p156_p3, %p42_p0  ;;  %s971_s27 = smov [#allocation5]  }
   0xb   : > { %s1277_s24 = scalar_select %p1040_p4, 1, 0 }
   0xc   : > { %s1278_s25 = scalar_select %p1045_p6, 1, 0 }
   0xd   : > { %p1050_p8 = pnand %p570_p5, %p163_p7  ;;  %s175_s28 = sshll.u32 %s971_s27, 4  ;;  %s1054_s28 = int_to_ptr.vmem [resolvable:$true] %s175_s28 }
   0xe   : > { %s972_s30 = smov [#allocation7]   ;;  %s813_s9 = scalar_lea.hbm %s1269_s1, 2048 }
   0xf   : > { %p751_p9 = pneg %p1050_p8  ;;  %s191_s6 = sshll.u32 %s972_s30, 4  ;;  %s1065_s6 = int_to_ptr.vmem [resolvable:$true] %s191_s6 }
  0x10   : > { %p814_p12 = scmp.ne.s32.totalorder %s1269_s1, %s813_s9  ;;  %p820_p5 = scmp.lt.u32.totalorder %s813_s9, %s1269_s1 }
  0x11   : > { %p1061_p11 = pnand %p751_p9, %p1274_p1 }
  0x13   : > { %p815_p13 = pneg %p1061_p11 }
  0x15   : > { %p816_p0 = pnand %p815_p13, %p814_p12 }
  0x17   : > { %p817_p3 = pneg %p816_p0 }
  0x19   : > { %p822_p7 = pnand %p820_p5, %p817_p3 }
  0x1b   : > { %825 = shalt.err (!%p822_p7)
}
  0x1c   : > { %s826_s14 = scalar_lea.vmem %s1054_s28, 2048  ;;  %p834_p2 = scmp.lt.s32.totalorder %s1054_s28, %s1054_s28 }
  0x1d   : > { %p827_p9 = scmp.ne.s32.totalorder %s1054_s28, %s826_s14  ;;  %p835_p12 = scmp.lt.s32.totalorder %s826_s14, %s826_s14 }
  0x1f   : > { %p829_p10 = pnand %p827_p9, %p815_p13  ;;  %p836_p0 = por %p835_p12, %p834_p2 }
  0x21   : > { %p830_p1 = pneg %p829_p10 }
  0x23   : > { %p837_p6 = pnand %p836_p0, %p830_p1 }
  0x25   : > { %840 = shalt.err (!%p837_p6)
}
  0x26   : > { %s973_s15 = smov 128   ;;  %s974_s16 = smov 8  }
  0x27   : > { %754 = dma.hbm_to_vmem [thread:$0]  (!%p1061_p11), %s1269_s1, 2048, %s1054_s28, [#allocation6], %s973_s15, %s973_s15, %s974_s16  }
  0x28   : > { %s841_s7 = scalar_lea.hbm %s1271_s3, 2048 }
  0x29   : > { %p842_p2 = scmp.ne.s32.totalorder %s1271_s3, %s841_s7  ;;  %p848_p10 = scmp.lt.u32.totalorder %s841_s7, %s1271_s3 }
  0x2b   : > { %p844_p1 = pnand %p842_p2, %p815_p13 }
  0x2d   : > { %p845_p6 = pneg %p844_p1 }
  0x2f   : > { %p850_p3 = pnand %p848_p10, %p845_p6 }
  0x31   : > { %853 = shalt.err (!%p850_p3)
}
  0x32   : > { %s854_s28 = scalar_lea.vmem %s1065_s6, 2048  ;;  %p862_p12 = scmp.lt.s32.totalorder %s1065_s6, %s1065_s6 }
  0x33   : > { %p855_p5 = scmp.ne.s32.totalorder %s1065_s6, %s854_s28  ;;  %p863_p0 = scmp.lt.s32.totalorder %s854_s28, %s854_s28 }
  0x35   : > { %p857_p7 = pnand %p855_p5, %p815_p13  ;;  %p864_p2 = por %p863_p0, %p862_p12 }
  0x37   : > { %p858_p9 = pneg %p857_p7 }
  0x39   : > { %p865_p1 = pnand %p864_p2, %p858_p9 }
  0x3b   : > { %868 = shalt.err (!%p865_p1)
}
  0x3c   : > { %757 = dma.hbm_to_vmem [thread:$0]  (!%p1061_p11), %s1271_s3, 2048, %s1065_s6, [#allocation6], %s973_s15, %s973_s15, %s974_s16  }
  0x3d   : > { %s1120_s14 = sadd.s32 1, %s969_s21   ;;  %s29_s29 = sadd.s32 1, %s965_s20 }
  0x3e   : > { %s26_s17 = ssub.s32 %s969_s21, %s1120_s14  ;;  %p36_p13 = scmp.ne.s32.totalorder %s965_s20, %s961_s19 }
  0x3f   : > { %p27_p6 = scmp.eq.s32.totalorder %s26_s17, 0  ;;  %p37_p10 = scmp.eq.s32.totalorder %s969_s21, 0 }
  0x40   : > { %p1281_p3 = scmp.eq.s32.totalorder %s1031_s22, 1  ;;  %p768_p7 = scmp.lt.s32.totalorder %s969_s21, 2 }
  0x41   : > { %s1136_s27 = scalar_select %p27_p6, %s965_s20, %s29_s29  }
  0x42   : > { %p1130_p5 = por %p1281_p3, %p36_p13  ;;  %p38_p9 = por %p37_p10, %p36_p13 }
  0x43   : > { %s208_s30 = sand.u32 1, %s965_s20   ;;  %s575_s6 = sshll.u32 %s969_s21, 7 }
  0x44   : > { %s1282_s23 = scalar_select %p1130_p5, 1, 0 }
  0x45   : > { %s574_s7 = sshll.u32 %s208_s30, 3  ;;  %s1143_s8 = scalar_lea.hbm %s1268_s0, %s575_s6 }
  0x46   : > { %s212_s9 = scalar_lea.vmem [#allocation2], %s574_s7  ;;  %p1147_p11 = pnand %p768_p7, %p38_p9 }
  0x47   : > { %s219_s10 = sshll.u32 %s212_s9, 4  ;;  %s209_s28 = scalar_lea.sflag [#allocation3], %s208_s30  ;;  %s1145_s10 = int_to_ptr.vmem [resolvable:$true] %s219_s10 }
  0x48   : > { %s869_s12 = scalar_lea.hbm %s1143_s8, 128  ;;  %p871_p0 = pneg %p1147_p11 }
  0x49   : > { %p870_p12 = scmp.ne.s32.totalorder %s1143_s8, %s869_s12  ;;  %s874_s17 = scalar_lea.hbm %s1268_s0, 256 }
  0x4a   : > { %p875_p13 = scmp.lt.u32.totalorder %s1143_s8, %s1268_s0  ;;  %p876_p6 = scmp.lt.u32.totalorder %s874_s17, %s869_s12 }
  0x4b   : > { %p872_p2 = pnand %p871_p0, %p870_p12  ;;  %p878_p3 = scmp.lt.u32.totalorder %s869_s12, %s1143_s8 }
  0x4c   : > { %p877_p10 = por %p876_p6, %p875_p13 }
  0x4d   : > { %p873_p1 = pneg %p872_p2 }
  0x4e   : > { %p879_p7 = por %p878_p3, %p877_p10 }
  0x50   : > { %p880_p9 = pnand %p879_p7, %p873_p1 }
  0x52   : > { %883 = shalt.err (!%p880_p9)
}
  0x53   : > { %s884_s30 = scalar_lea.vmem %s1145_s10, 128  ;;  %s975_s15 = smov [#allocation2]  }
  0x54   : > { %p885_p12 = scmp.ne.s32.totalorder %s1145_s10, %s884_s30  ;;  %s889_s16 = sshll.u32 %s975_s15, 4  ;;  %s890_s16 = int_to_ptr.vmem [resolvable:$false] %s889_s16 }
  0x55   : > { %s891_s9 = scalar_lea.vmem %s890_s16, 256  ;;  %p892_p4 = scmp.lt.s32.totalorder %s1145_s10, %s890_s16 }
  0x56   : > { %p887_p2 = pnand %p885_p12, %p871_p0  ;;  %p893_p13 = scmp.lt.s32.totalorder %s891_s9, %s884_s30 }
  0x58   : > { %p888_p5 = pneg %p887_p2  ;;  %p894_p6 = por %p893_p13, %p892_p4 }
  0x5a   : > { %p895_p10 = pnand %p894_p6, %p888_p5 }
  0x5c   : > { %898 = shalt.err (!%p895_p10)
}
  0x5d   : > { %761 = dma.hbm_to_vmem [thread:$0]  (!%p1147_p11), %s1143_s8, 128, %s1145_s10, %s209_s28  }
  0x5e   : > { %228 = sbr.rel (%p1050_p8) target bundleno = 606 (0x25e), region = 40  ;;  %s1179_s12 = sand.u32 (!%p1050_p8), 1, %s961_s19  }
  0x5f   : > { %s577_s13 = sshll.u32 (!%p1050_p8), %s1179_s12, 3  ;;  %s231_s29 = scalar_lea.sflag (!%p1050_p8), [#allocation3], %s1179_s12 }
  0x60   : > { %s1185_s17 = scalar_lea.vmem (!%p1050_p8), [#allocation2], %s577_s13  ;;  %p1284_p4 = scmp.ne.s32.totalorder (!%p1050_p8), %s1277_s24, 0 }
  0x65   : > { %944 = dma.done.wait (%p1284_p4), %s231_s29, 128  }
  0x66   : > { %946 = vsyncadd (%p1284_p4), %s231_s29, 4294967168  ;;  %p1285_p5 = scmp.eq.s32.totalorder %s1031_s22, 0 }
  0x68   : > { %948 = dma.done.wait (%p1285_p5), [#allocation6], 4096   ;;  %p1286_p8 = pmov %p1285_p5 }
  0x69   : > { %v976_v0 = vmov 0.0|0.0   ;;  %vm977_vm0 = vmmov 0   ;;  %v978_v1 = vmov 0.0   ;;  %v270_v2 = vld [vmem:[#allocation5] sm:$0xff]  ;;  %v271_v3 = vld [vmem:[#allocation5 + $0x8] sm:$0xff]  ;;  %v272_v4 = vld [vmem:[#allocation5 + $0x10] sm:$0xff] }
  0x6a   : > { %950 = vsyncadd (%p1286_p8), [#allocation6], 4294963200  ;;  %691 = vmatprep.subr.bf16.mxu0 %v976_v0  ;;  %653 = vmatprep.mubr.msk.f32.mxu0 %vm977_vm0, %v978_v1  ;;  %v692_v5 = vpack.c.bf16 %v271_v3, %v270_v2  ;;  %v273_v6 = vld [vmem:[#allocation5 + $0x18] sm:$0xff]  ;;  %v274_v8 = vld [vmem:[#allocation5 + $0x20] sm:$0xff]  ;;  %s584_s11 = sshll.u32 %s1031_s22, 7  ;;  %s268_s28 = scalar_lea.vmem [#allocation8], %s577_s13 }
  0x6b   : > { %715 = vmatprep.subr.bf16.mxu1 %v976_v0  ;;  %688 = vmatprep.mubr.msk.f32.mxu1 %vm977_vm0, %v978_v1  ;;  %v695_v7 = vpack.c.bf16 %v273_v6, %v272_v4  ;;  %v275_v9 = vld [vmem:[#allocation5 + $0x28] sm:$0xff]  ;;  %v372_v10 = vld [vmem:[#allocation7] sm:$0xff]  ;;  %v276_v14 = vld [vmem:[#allocation5 + $0x30] sm:$0xff]  ;;  %s480_s7 = sshll.u32 %s268_s28, 4  ;;  %s1224_s15 = scalar_lea.hbm %s1273_s5, %s584_s11  ;;  %s1226_s7 = int_to_ptr.vmem [resolvable:$true] %s480_s7 }
  0x6c   : > { %693 = vmatpush3.bf16.msra.mxu0 %v692_v5  ;;  %v373_v11 = vld [vmem:[#allocation7 + $0x8] sm:$0xff]  ;;  %v698_v12 = vpack.c.bf16 %v275_v9, %v274_v8  ;;  %v277_v15 = vld [vmem:[#allocation5 + $0x38] sm:$0xff]  ;;  %v278_v17 = vld [vmem:[#allocation5 + $0x40] sm:$0xff]  ;;  %s467_s16 = scalar_lea.sflag [#allocation4], %s1179_s12  ;;  %s899_s9 = scalar_lea.vmem %s1226_s7, 128 }
  0x6d   : > { %694 = vmatprep.subr.bf16.mxu0 %v976_v0  ;;  %v716_v13 = vpack.c.bf16 %v373_v11, %v372_v10  ;;  %v701_v16 = vpack.c.bf16 %v277_v15, %v276_v14  ;;  %v279_v18 = vld [vmem:[#allocation5 + $0x48] sm:$0xff]  ;;  %v280_v20 = vld [vmem:[#allocation5 + $0x50] sm:$0xff]  ;;  %v281_v21 = vld [vmem:[#allocation5 + $0x58] sm:$0xff]  ;;  %p900_p11 = scmp.ne.s32.totalorder %s1226_s7, %s899_s9  ;;  %p1287_p0 = scmp.ne.s32.totalorder %s1282_s23, 0 }
  0x6e   : > { %v704_v19 = vpack.c.bf16 %v279_v18, %v278_v17  ;;  %v707_v22 = vpack.c.bf16 %v281_v21, %v280_v20  ;;  %v282_v23 = vld [vmem:[#allocation5 + $0x60] sm:$0xff]  ;;  %v283_v24 = vld [vmem:[#allocation5 + $0x68] sm:$0xff]  ;;  %v284_v26 = vld [vmem:[#allocation5 + $0x70] sm:$0xff]  ;;  %s979_s22 = smov [#allocation8]  }
  0x6f   : > { %717 = vmatpush3.bf16.msra.mxu1 %v716_v13  ;;  %v710_v25 = vpack.c.bf16 %v283_v24, %v282_v23  ;;  %v285_v27 = vld [vmem:[#allocation5 + $0x78] sm:$0xff]  ;;  %v374_v30 = vld [vmem:[#allocation7 + $0x10] sm:$0xff]  ;;  %v376_v33 = vld [vmem:[#allocation7 + $0x20] sm:$0xff]  ;;  %p901_p1 = pnand %p900_p11, %p1287_p0  ;;  %s903_s13 = sshll.u32 %s979_s22, 4  ;;  %s904_s13 = int_to_ptr.vmem [resolvable:$false] %s903_s13 }
  0x70   : > { %696 = vmatpush3.bf16.msra.mxu0 %v695_v7  ;;  %718 = vmatprep.subr.bf16.mxu1 %v976_v0  ;;  %v713_v28 = vpack.c.bf16 %v285_v27, %v284_v26  ;;  %v269_v29 = vld [vmem:[%s1185_s17] sm:$0xff]  ;;  %v377_v34 = vld [vmem:[#allocation7 + $0x28] sm:$0xff]  ;;  %v380_v39 = vld [vmem:[#allocation7 + $0x40] sm:$0xff]  ;;  %s905_s29 = scalar_lea.vmem %s904_s13, 256  ;;  %p906_p7 = scmp.lt.s32.totalorder %s1226_s7, %s904_s13 }
  0x71   : > { %697 = vmatprep.subr.bf16.mxu0 %v976_v0  ;;  %v375_v31 = vld [vmem:[#allocation7 + $0x18] sm:$0xff]  ;;  %v722_v35 = vpack.c.bf16 %v377_v34, %v376_v33  ;;  %v378_v36 = vld [vmem:[#allocation7 + $0x30] sm:$0xff]  ;;  %v381_v40 = vld [vmem:[#allocation7 + $0x48] sm:$0xff]  ;;  %p902_p3 = pneg %p901_p1  ;;  %p907_p9 = scmp.lt.s32.totalorder %s905_s29, %s899_s9 }
  0x72   : > { %v719_v32 = vpack.c.bf16 %v375_v31, %v374_v30  ;;  %v379_v37 = vld [vmem:[#allocation7 + $0x38] sm:$0xff]  ;;  %v728_v41 = vpack.c.bf16 %v381_v40, %v380_v39  ;;  %v382_v42 = vld [vmem:[#allocation7 + $0x50] sm:$0xff]  ;;  %v384_v45 = vld [vmem:[#allocation7 + $0x60] sm:$0xff] }
  0x73   : > { %v725_v38 = vpack.c.bf16 %v379_v37, %v378_v36  ;;  %v383_v43 = vld [vmem:[#allocation7 + $0x58] sm:$0xff]  ;;  %v385_v46 = vld [vmem:[#allocation7 + $0x68] sm:$0xff]  ;;  %v386_v48 = vld [vmem:[#allocation7 + $0x70] sm:$0xff]  ;;  %p908_p12 = por %p907_p9, %p906_p7 }
  0x74   : > { %699 = vmatpush3.bf16.msra.mxu0 %v698_v12  ;;  %720 = vmatpush3.bf16.msra.mxu1 %v719_v32  ;;  %v731_v44 = vpack.c.bf16 %v383_v43, %v382_v42  ;;  %v734_v47 = vpack.c.bf16 %v385_v46, %v384_v45  ;;  %v387_v49 = vld [vmem:[#allocation7 + $0x78] sm:$0xff]  ;;  %v581_v51 = vld [vmem:[%s1270_s2] ss:$0 sm:$0xff] }
  0x75   : > { %700 = vmatprep.subr.bf16.mxu0 %v976_v0  ;;  %721 = vmatprep.subr.bf16.mxu1 %v976_v0  ;;  %v737_v50 = vpack.c.bf16 %v387_v49, %v386_v48  ;;  %p909_p2 = pnand %p908_p12, %p902_p3 }
  0x78   : > { %702 = vmatpush3.bf16.msra.mxu0 %v701_v16  ;;  %723 = vmatpush3.bf16.msra.mxu1 %v722_v35 }
  0x79   : > { %703 = vmatprep.subr.bf16.mxu0 %v976_v0  ;;  %724 = vmatprep.subr.bf16.mxu1 %v976_v0 }
  0x7c   : > { %705 = vmatpush3.bf16.msra.mxu0 %v704_v19  ;;  %726 = vmatpush3.bf16.msra.mxu1 %v725_v38 }
  0x7d   : > { %706 = vmatprep.subr.bf16.mxu0 %v976_v0  ;;  %727 = vmatprep.subr.bf16.mxu1 %v976_v0 }
  0x80   : > { %708 = vmatpush3.bf16.msra.mxu0 %v707_v22  ;;  %729 = vmatpush3.bf16.msra.mxu1 %v728_v41 }
  0x81   : > { %709 = vmatprep.subr.bf16.mxu0 %v976_v0  ;;  %730 = vmatprep.subr.bf16.mxu1 %v976_v0 }
  0x84   : > { %711 = vmatpush3.bf16.msra.mxu0 %v710_v25  ;;  %732 = vmatpush3.bf16.msra.mxu1 %v731_v44 }
  0x85   : > { %712 = vmatprep.subr.bf16.mxu0 %v976_v0  ;;  %733 = vmatprep.subr.bf16.mxu1 %v976_v0 }
  0x88   : > { %714 = vmatpush3.bf16.msra.mxu0 %v713_v28  ;;  %735 = vmatpush3.bf16.msra.mxu1 %v734_v47 }
  0x89   : > { %736 = vmatprep.subr.bf16.mxu1 %v976_v0  ;;  %v582_v0 = vld [vmem:[%s1272_s4] ss:$0 sm:$0xff] }
  0x8b   : > { %654 = vmatmul.mubr.f32.vlgmr.msra.gmra.mrb[0].mxu0 %v269_v29 }
  0x8c   : > { %738 = vmatpush3.bf16.msra.mxu1 %v737_v50 }
 0x15e   : > { %v359_v52 = vpop.f32.mrb[0].mxu0 }
 0x15f   : > { %v360_v53 = vadd.f32 %v581_v51, %v359_v52  ;;  %v655_v54 = vpop.f32.mrb[1].mxu0 }
 0x161   : > { %v364_v55 = vmul.f32 %v360_v53, %v360_v53  ;;  %v363_v61 = vmul.f32 0.5, %v360_v53 }
 0x163   : > { %v365_v56 = vmul.f32 %v364_v55, %v360_v53 }
 0x165   : > { %v366_v57 = vmul.f32 0.044715, %v365_v56 }
 0x167   : > { %v367_v58 = vadd.f32 %v366_v57, %v360_v53 }
 0x169   : > { %v368_v59 = vmul.f32 0.7978846, %v367_v58 }
 0x16b   : > { %811 = vtanh.f32 %v368_v59 }
 0x175   : > { %v812_v60 = vpop.eup %811 }
 0x176   : > { %v370_v62 = vadd.f32 1.0, %v812_v60 }
 0x178   : > { %v371_v63 = vmul.f32 %v370_v62, %v363_v61 }
 0x17a   : > { %689 = vmatmul.mubr.f32.vlgmr.msra.gmra.mrb[0].mxu1 %v371_v63 }
 0x24d   : > { %v461_v1 = vpop.f32.mrb[0].mxu1 }
 0x24e   : > { %v462_v2 = vadd.f32 %v582_v0, %v461_v1  ;;  %v690_v3 = vpop.f32.mrb[1].mxu1 }
 0x250   : > { %465 = vst [vmem:[%s268_s28] sm:$0xff] %v462_v2 }
 0x251   : > { %912 = shalt.err (!%p909_p2)
}
 0x252   : > { %s913_s12 = scalar_lea.hbm %s1224_s15, 128  ;;  %s917_s26 = scalar_lea.hbm %s1273_s5, 256 }
 0x253   : > { %p914_p13 = scmp.ne.s32.totalorder %s1224_s15, %s913_s12  ;;  %p918_p4 = scmp.lt.u32.totalorder %s1224_s15, %s1273_s5 }
 0x254   : > { %p919_p5 = scmp.lt.u32.totalorder %s917_s26, %s913_s12  ;;  %p921_p11 = scmp.lt.u32.totalorder %s913_s12, %s1224_s15 }
 0x255   : > { %p915_p6 = pnand %p914_p13, %p1287_p0 }
 0x256   : > { %p920_p8 = por %p919_p5, %p918_p4 }
 0x257   : > { %p916_p10 = pneg %p915_p6 }
 0x258   : > { %p922_p1 = por %p921_p11, %p920_p8 }
 0x25a   : > { %p923_p3 = pnand %p922_p1, %p916_p10 }
 0x25c   : > { %926 = shalt.err (!%p923_p3)
}
 0x25d   : > { %749 = dma.vmem_to_hbm [thread:$0]  (%p1287_p0), %s1226_s7, 128, %s1224_s15, %s467_s16  }
 0x25e PF: > { %s492_s11 = sand.u32 1, %s957_s18   ;;  %p1288_p7 = scmp.ne.s32.totalorder %s1278_s25, 0 }
 0x25f   : > { %p1289_p9 = scmp.ge.s32.totalorder %s969_s21, 2  ;;  %s493_s28 = scalar_lea.sflag [#allocation4], %s492_s11 }
 0x261   : > { %p763_p12 = pnand %p1289_p9, %p1288_p7 }
 0x263   : > { %952 = dma.done.wait (!%p763_p12), %s493_s28, 128  }
 0x264   : > { %954 = vsyncadd (!%p763_p12), %s493_s28, 4294967168  ;;  %p19_p2 = scmp.ge.s32.totalorder %s1120_s14, 4   ;;  %s1290_s18 = smov %s961_s19 }
 0x265   : > { %s1291_s19 = smov %s965_s20  ;;  %s1292_s20 = smov %s1136_s27 }
 0x266   : > { %s1293_s21 = smov %s1120_s14  ;;  %21 = sbr.rel (!%p19_p2) target bundleno = 6 (0x6), region = 93 }
 0x26d   :  { %498 = vsyncpa [#allocation3], 1 }
 0x26e   :  { %500 = vsyncpa [#allocation3 + $0x1], 1 }
 0x26f   :  { %501 = vsyncpa [#allocation6], 1 }
 0x270   :  { %502 = vsyncpa [#allocation4], 1 }
 0x271   :  { %504 = vsyncpa [#allocation4 + $0x1], 1 }

// kernel: tpu_custom_call.1
= control target key start
LH: loop header
LB: loop body
LE: loop exit
PB: predicated region body
PF: predicated region fallthrough
CT: control target
= control target key end

     0   :  { %10 = vsyncpa [#allocation3], 0  ;;  %s1268_s0 = inlined_call_operand.hbm [shape: f32[16,128], index: 0, kind: input, shape index: {}]   ;;  %s1269_s1 = inlined_call_operand.hbm [shape: f32[128,128], index: 1, kind: input, shape index: {}]   ;;  %s1270_s2 = inlined_call_operand.vmem [shape: f32[1,128], index: 2, kind: input, shape index: {}]   ;;  %s1271_s3 = inlined_call_operand.hbm [shape: f32[128,128], index: 3, kind: input, shape index: {}]   ;;  %s1272_s4 = inlined_call_operand.vmem [shape: f32[1,128], index: 4, kind: input, shape index: {}]   ;;  %s1273_s5 = inlined_call_operand.hbm [shape: f32[16,128], index: 5, kind: output, shape index: {}]  }
   0x1   :  { %12 = vsyncpa [#allocation3 + $0x1], 0 }
   0x2   :  { %13 = vsyncpa [#allocation6], 0 }
   0x3   :  { %14 = vsyncpa [#allocation4], 0 }
   0x4   :  { %16 = vsyncpa [#allocation4 + $0x1], 0  ;;  %s1010_s18 = smov 0   ;;  %s1012_s19 = smov 0  }
   0x5   :  { %s1014_s20 = smov 0   ;;  %s1016_s21 = smov 0  }
   0x6 LB: > { %s1031_s22 = sadd.s32 4294967295, %s969_s21   ;;  %s569_s23 = sadd.s32 4294967294, %s969_s21   ;;  %s969_s21 = sphi %s1016_s21, %s1293_s21   ;;  %s965_s20 = sphi %s1014_s20, %s1292_s20   ;;  %s961_s19 = sphi %s1012_s19, %s1291_s19   ;;  %s957_s18 = sphi %s1010_s18, %s1290_s18  }
   0x7   : > { %p42_p0 = scmp.ne.s32.totalorder %s961_s19, %s957_s18  ;;  %p1274_p1 = scmp.eq.s32.totalorder %s1031_s22, 0 }
   0x8   : > { %p156_p3 = scmp.eq.s32.totalorder %s569_s23, 1  ;;  %p570_p5 = scmp.ge.s32.totalorder %s969_s21, 1 }
   0x9   : > { %p1040_p4 = por %p1274_p1, %p42_p0  ;;  %p163_p7 = scmp.lt.s32.totalorder %s969_s21, 3 }
   0xa   : > { %p1045_p6 = por %p156_p3, %p42_p0  ;;  %s971_s27 = smov [#allocation5]  }
   0xb   : > { %s1277_s24 = scalar_select %p1040_p4, 1, 0 }
   0xc   : > { %s1278_s25 = scalar_select %p1045_p6, 1, 0 }
   0xd   : > { %p1050_p8 = pnand %p570_p5, %p163_p7  ;;  %s175_s28 = sshll.u32 %s971_s27, 4  ;;  %s1054_s28 = int_to_ptr.vmem [resolvable:$true] %s175_s28 }
   0xe   : > { %s972_s30 = smov [#allocation7]   ;;  %s813_s9 = scalar_lea.hbm %s1269_s1, 2048 }
   0xf   : > { %p751_p9 = pneg %p1050_p8  ;;  %s191_s6 = sshll.u32 %s972_s30, 4  ;;  %s1065_s6 = int_to_ptr.vmem [resolvable:$true] %s191_s6 }
  0x10   : > { %p814_p12 = scmp.ne.s32.totalorder %s1269_s1, %s813_s9  ;;  %p820_p5 = scmp.lt.u32.totalorder %s813_s9, %s1269_s1 }
  0x11   : > { %p1061_p11 = pnand %p751_p9, %p1274_p1 }
  0x13   : > { %p815_p13 = pneg %p1061_p11 }
  0x15   : > { %p816_p0 = pnand %p815_p13, %p814_p12 }
  0x17   : > { %p817_p3 = pneg %p816_p0 }
  0x19   : > { %p822_p7 = pnand %p820_p5, %p817_p3 }
  0x1b   : > { %825 = shalt.err (!%p822_p7)
}
  0x1c   : > { %s826_s14 = scalar_lea.vmem %s1054_s28, 2048  ;;  %p834_p2 = scmp.lt.s32.totalorder %s1054_s28, %s1054_s28 }
  0x1d   : > { %p827_p9 = scmp.ne.s32.totalorder %s1054_s28, %s826_s14  ;;  %p835_p12 = scmp.lt.s32.totalorder %s826_s14, %s826_s14 }
  0x1f   : > { %p829_p10 = pnand %p827_p9, %p815_p13  ;;  %p836_p0 = por %p835_p12, %p834_p2 }
  0x21   : > { %p830_p1 = pneg %p829_p10 }
  0x23   : > { %p837_p6 = pnand %p836_p0, %p830_p1 }
  0x25   : > { %840 = shalt.err (!%p837_p6)
}
  0x26   : > { %s973_s15 = smov 128   ;;  %s974_s16 = smov 8  }
  0x27   : > { %754 = dma.hbm_to_vmem [thread:$0]  (!%p1061_p11), %s1269_s1, 2048, %s1054_s28, [#allocation6], %s973_s15, %s973_s15, %s974_s16  }
  0x28   : > { %s841_s7 = scalar_lea.hbm %s1271_s3, 2048 }
  0x29   : > { %p842_p2 = scmp.ne.s32.totalorder %s1271_s3, %s841_s7  ;;  %p848_p10 = scmp.lt.u32.totalorder %s841_s7, %s1271_s3 }
  0x2b   : > { %p844_p1 = pnand %p842_p2, %p815_p13 }
  0x2d   : > { %p845_p6 = pneg %p844_p1 }
  0x2f   : > { %p850_p3 = pnand %p848_p10, %p845_p6 }
  0x31   : > { %853 = shalt.err (!%p850_p3)
}
  0x32   : > { %s854_s28 = scalar_lea.vmem %s1065_s6, 2048  ;;  %p862_p12 = scmp.lt.s32.totalorder %s1065_s6, %s1065_s6 }
  0x33   : > { %p855_p5 = scmp.ne.s32.totalorder %s1065_s6, %s854_s28  ;;  %p863_p0 = scmp.lt.s32.totalorder %s854_s28, %s854_s28 }
  0x35   : > { %p857_p7 = pnand %p855_p5, %p815_p13  ;;  %p864_p2 = por %p863_p0, %p862_p12 }
  0x37   : > { %p858_p9 = pneg %p857_p7 }
  0x39   : > { %p865_p1 = pnand %p864_p2, %p858_p9 }
  0x3b   : > { %868 = shalt.err (!%p865_p1)
}
  0x3c   : > { %757 = dma.hbm_to_vmem [thread:$0]  (!%p1061_p11), %s1271_s3, 2048, %s1065_s6, [#allocation6], %s973_s15, %s973_s15, %s974_s16  }
  0x3d   : > { %s1120_s14 = sadd.s32 1, %s969_s21   ;;  %s29_s29 = sadd.s32 1, %s965_s20 }
  0x3e   : > { %s26_s17 = ssub.s32 %s969_s21, %s1120_s14  ;;  %p36_p13 = scmp.ne.s32.totalorder %s965_s20, %s961_s19 }
  0x3f   : > { %p27_p6 = scmp.eq.s32.totalorder %s26_s17, 0  ;;  %p37_p10 = scmp.eq.s32.totalorder %s969_s21, 0 }
  0x40   : > { %p1281_p3 = scmp.eq.s32.totalorder %s1031_s22, 1  ;;  %p768_p7 = scmp.lt.s32.totalorder %s969_s21, 2 }
  0x41   : > { %s1136_s27 = scalar_select %p27_p6, %s965_s20, %s29_s29  }
  0x42   : > { %p1130_p5 = por %p1281_p3, %p36_p13  ;;  %p38_p9 = por %p37_p10, %p36_p13 }
  0x43   : > { %s208_s30 = sand.u32 1, %s965_s20   ;;  %s575_s6 = sshll.u32 %s969_s21, 7 }
  0x44   : > { %s1282_s23 = scalar_select %p1130_p5, 1, 0 }
  0x45   : > { %s574_s7 = sshll.u32 %s208_s30, 3  ;;  %s1143_s8 = scalar_lea.hbm %s1268_s0, %s575_s6 }
  0x46   : > { %s212_s9 = scalar_lea.vmem [#allocation2], %s574_s7  ;;  %p1147_p11 = pnand %p768_p7, %p38_p9 }
  0x47   : > { %s219_s10 = sshll.u32 %s212_s9, 4  ;;  %s209_s28 = scalar_lea.sflag [#allocation3], %s208_s30  ;;  %s1145_s10 = int_to_ptr.vmem [resolvable:$true] %s219_s10 }
  0x48   : > { %s869_s12 = scalar_lea.hbm %s1143_s8, 128  ;;  %p871_p0 = pneg %p1147_p11 }
  0x49   : > { %p870_p12 = scmp.ne.s32.totalorder %s1143_s8, %s869_s12  ;;  %s874_s17 = scalar_lea.hbm %s1268_s0, 256 }
  0x4a   : > { %p875_p13 = scmp.lt.u32.totalorder %s1143_s8, %s1268_s0  ;;  %p876_p6 = scmp.lt.u32.totalorder %s874_s17, %s869_s12 }
  0x4b   : > { %p872_p2 = pnand %p871_p0, %p870_p12  ;;  %p878_p3 = scmp.lt.u32.totalorder %s869_s12, %s1143_s8 }
  0x4c   : > { %p877_p10 = por %p876_p6, %p875_p13 }
  0x4d   : > { %p873_p1 = pneg %p872_p2 }
  0x4e   : > { %p879_p7 = por %p878_p3, %p877_p10 }
  0x50   : > { %p880_p9 = pnand %p879_p7, %p873_p1 }
  0x52   : > { %883 = shalt.err (!%p880_p9)
}
  0x53   : > { %s884_s30 = scalar_lea.vmem %s1145_s10, 128  ;;  %s975_s15 = smov [#allocation2]  }
  0x54   : > { %p885_p12 = scmp.ne.s32.totalorder %s1145_s10, %s884_s30  ;;  %s889_s16 = sshll.u32 %s975_s15, 4  ;;  %s890_s16 = int_to_ptr.vmem [resolvable:$false] %s889_s16 }
  0x55   : > { %s891_s9 = scalar_lea.vmem %s890_s16, 256  ;;  %p892_p4 = scmp.lt.s32.totalorder %s1145_s10, %s890_s16 }
  0x56   : > { %p887_p2 = pnand %p885_p12, %p871_p0  ;;  %p893_p13 = scmp.lt.s32.totalorder %s891_s9, %s884_s30 }
  0x58   : > { %p888_p5 = pneg %p887_p2  ;;  %p894_p6 = por %p893_p13, %p892_p4 }
  0x5a   : > { %p895_p10 = pnand %p894_p6, %p888_p5 }
  0x5c   : > { %898 = shalt.err (!%p895_p10)
}
  0x5d   : > { %761 = dma.hbm_to_vmem [thread:$0]  (!%p1147_p11), %s1143_s8, 128, %s1145_s10, %s209_s28  }
  0x5e   : > { %228 = sbr.rel (%p1050_p8) target bundleno = 606 (0x25e), region = 40  ;;  %s1179_s12 = sand.u32 (!%p1050_p8), 1, %s961_s19  }
  0x5f   : > { %s577_s13 = sshll.u32 (!%p1050_p8), %s1179_s12, 3  ;;  %s231_s29 = scalar_lea.sflag (!%p1050_p8), [#allocation3], %s1179_s12 }
  0x60   : > { %s1185_s17 = scalar_lea.vmem (!%p1050_p8), [#allocation2], %s577_s13  ;;  %p1284_p4 = scmp.ne.s32.totalorder (!%p1050_p8), %s1277_s24, 0 }
  0x65   : > { %944 = dma.done.wait (%p1284_p4), %s231_s29, 128  }
  0x66   : > { %946 = vsyncadd (%p1284_p4), %s231_s29, 4294967168  ;;  %p1285_p5 = scmp.eq.s32.totalorder %s1031_s22, 0 }
  0x68   : > { %948 = dma.done.wait (%p1285_p5), [#allocation6], 4096   ;;  %p1286_p8 = pmov %p1285_p5 }
  0x69   : > { %v976_v0 = vmov 0.0|0.0   ;;  %vm977_vm0 = vmmov 0   ;;  %v978_v1 = vmov 0.0   ;;  %v270_v2 = vld [vmem:[#allocation5] sm:$0xff]  ;;  %v271_v3 = vld [vmem:[#allocation5 + $0x8] sm:$0xff]  ;;  %v272_v4 = vld [vmem:[#allocation5 + $0x10] sm:$0xff] }
  0x6a   : > { %950 = vsyncadd (%p1286_p8), [#allocation6], 4294963200  ;;  %691 = vmatprep.subr.bf16.mxu0 %v976_v0  ;;  %653 = vmatprep.mubr.msk.f32.mxu0 %vm977_vm0, %v978_v1  ;;  %v692_v5 = vpack.c.bf16 %v271_v3, %v270_v2  ;;  %v273_v6 = vld [vmem:[#allocation5 + $0x18] sm:$0xff]  ;;  %v274_v8 = vld [vmem:[#allocation5 + $0x20] sm:$0xff]  ;;  %s584_s11 = sshll.u32 %s1031_s22, 7  ;;  %s268_s28 = scalar_lea.vmem [#allocation8], %s577_s13 }
  0x6b   : > { %715 = vmatprep.subr.bf16.mxu1 %v976_v0  ;;  %688 = vmatprep.mubr.msk.f32.mxu1 %vm977_vm0, %v978_v1  ;;  %v695_v7 = vpack.c.bf16 %v273_v6, %v272_v4  ;;  %v275_v9 = vld [vmem:[#allocation5 + $0x28] sm:$0xff]  ;;  %v372_v10 = vld [vmem:[#allocation7] sm:$0xff]  ;;  %v276_v14 = vld [vmem:[#allocation5 + $0x30] sm:$0xff]  ;;  %s480_s7 = sshll.u32 %s268_s28, 4  ;;  %s1224_s15 = scalar_lea.hbm %s1273_s5, %s584_s11  ;;  %s1226_s7 = int_to_ptr.vmem [resolvable:$true] %s480_s7 }
  0x6c   : > { %693 = vmatpush3.bf16.msra.mxu0 %v692_v5  ;;  %v373_v11 = vld [vmem:[#allocation7 + $0x8] sm:$0xff]  ;;  %v698_v12 = vpack.c.bf16 %v275_v9, %v274_v8  ;;  %v277_v15 = vld [vmem:[#allocation5 + $0x38] sm:$0xff]  ;;  %v278_v17 = vld [vmem:[#allocation5 + $0x40] sm:$0xff]  ;;  %s467_s16 = scalar_lea.sflag [#allocation4], %s1179_s12  ;;  %s899_s9 = scalar_lea.vmem %s1226_s7, 128 }
  0x6d   : > { %694 = vmatprep.subr.bf16.mxu0 %v976_v0  ;;  %v716_v13 = vpack.c.bf16 %v373_v11, %v372_v10  ;;  %v701_v16 = vpack.c.bf16 %v277_v15, %v276_v14  ;;  %v279_v18 = vld [vmem:[#allocation5 + $0x48] sm:$0xff]  ;;  %v280_v20 = vld [vmem:[#allocation5 + $0x50] sm:$0xff]  ;;  %v281_v21 = vld [vmem:[#allocation5 + $0x58] sm:$0xff]  ;;  %p900_p11 = scmp.ne.s32.totalorder %s1226_s7, %s899_s9  ;;  %p1287_p0 = scmp.ne.s32.totalorder %s1282_s23, 0 }
  0x6e   : > { %v704_v19 = vpack.c.bf16 %v279_v18, %v278_v17  ;;  %v707_v22 = vpack.c.bf16 %v281_v21, %v280_v20  ;;  %v282_v23 = vld [vmem:[#allocation5 + $0x60] sm:$0xff]  ;;  %v283_v24 = vld [vmem:[#allocation5 + $0x68] sm:$0xff]  ;;  %v284_v26 = vld [vmem:[#allocation5 + $0x70] sm:$0xff]  ;;  %s979_s22 = smov [#allocation8]  }
  0x6f   : > { %717 = vmatpush3.bf16.msra.mxu1 %v716_v13  ;;  %v710_v25 = vpack.c.bf16 %v283_v24, %v282_v23  ;;  %v285_v27 = vld [vmem:[#allocation5 + $0x78] sm:$0xff]  ;;  %v374_v30 = vld [vmem:[#allocation7 + $0x10] sm:$0xff]  ;;  %v376_v33 = vld [vmem:[#allocation7 + $0x20] sm:$0xff]  ;;  %p901_p1 = pnand %p900_p11, %p1287_p0  ;;  %s903_s13 = sshll.u32 %s979_s22, 4  ;;  %s904_s13 = int_to_ptr.vmem [resolvable:$false] %s903_s13 }
  0x70   : > { %696 = vmatpush3.bf16.msra.mxu0 %v695_v7  ;;  %718 = vmatprep.subr.bf16.mxu1 %v976_v0  ;;  %v713_v28 = vpack.c.bf16 %v285_v27, %v284_v26  ;;  %v269_v29 = vld [vmem:[%s1185_s17] sm:$0xff]  ;;  %v377_v34 = vld [vmem:[#allocation7 + $0x28] sm:$0xff]  ;;  %v380_v39 = vld [vmem:[#allocation7 + $0x40] sm:$0xff]  ;;  %s905_s29 = scalar_lea.vmem %s904_s13, 256  ;;  %p906_p7 = scmp.lt.s32.totalorder %s1226_s7, %s904_s13 }
  0x71   : > { %697 = vmatprep.subr.bf16.mxu0 %v976_v0  ;;  %v375_v31 = vld [vmem:[#allocation7 + $0x18] sm:$0xff]  ;;  %v722_v35 = vpack.c.bf16 %v377_v34, %v376_v33  ;;  %v378_v36 = vld [vmem:[#allocation7 + $0x30] sm:$0xff]  ;;  %v381_v40 = vld [vmem:[#allocation7 + $0x48] sm:$0xff]  ;;  %p902_p3 = pneg %p901_p1  ;;  %p907_p9 = scmp.lt.s32.totalorder %s905_s29, %s899_s9 }
  0x72   : > { %v719_v32 = vpack.c.bf16 %v375_v31, %v374_v30  ;;  %v379_v37 = vld [vmem:[#allocation7 + $0x38] sm:$0xff]  ;;  %v728_v41 = vpack.c.bf16 %v381_v40, %v380_v39  ;;  %v382_v42 = vld [vmem:[#allocation7 + $0x50] sm:$0xff]  ;;  %v384_v45 = vld [vmem:[#allocation7 + $0x60] sm:$0xff] }
  0x73   : > { %v725_v38 = vpack.c.bf16 %v379_v37, %v378_v36  ;;  %v383_v43 = vld [vmem:[#allocation7 + $0x58] sm:$0xff]  ;;  %v385_v46 = vld [vmem:[#allocation7 + $0x68] sm:$0xff]  ;;  %v386_v48 = vld [vmem:[#allocation7 + $0x70] sm:$0xff]  ;;  %p908_p12 = por %p907_p9, %p906_p7 }
  0x74   : > { %699 = vmatpush3.bf16.msra.mxu0 %v698_v12  ;;  %720 = vmatpush3.bf16.msra.mxu1 %v719_v32  ;;  %v731_v44 = vpack.c.bf16 %v383_v43, %v382_v42  ;;  %v734_v47 = vpack.c.bf16 %v385_v46, %v384_v45  ;;  %v387_v49 = vld [vmem:[#allocation7 + $0x78] sm:$0xff]  ;;  %v581_v51 = vld [vmem:[%s1270_s2] ss:$0 sm:$0xff] }
  0x75   : > { %700 = vmatprep.subr.bf16.mxu0 %v976_v0  ;;  %721 = vmatprep.subr.bf16.mxu1 %v976_v0  ;;  %v737_v50 = vpack.c.bf16 %v387_v49, %v386_v48  ;;  %p909_p2 = pnand %p908_p12, %p902_p3 }
  0x78   : > { %702 = vmatpush3.bf16.msra.mxu0 %v701_v16  ;;  %723 = vmatpush3.bf16.msra.mxu1 %v722_v35 }
  0x79   : > { %703 = vmatprep.subr.bf16.mxu0 %v976_v0  ;;  %724 = vmatprep.subr.bf16.mxu1 %v976_v0 }
  0x7c   : > { %705 = vmatpush3.bf16.msra.mxu0 %v704_v19  ;;  %726 = vmatpush3.bf16.msra.mxu1 %v725_v38 }
  0x7d   : > { %706 = vmatprep.subr.bf16.mxu0 %v976_v0  ;;  %727 = vmatprep.subr.bf16.mxu1 %v976_v0 }
  0x80   : > { %708 = vmatpush3.bf16.msra.mxu0 %v707_v22  ;;  %729 = vmatpush3.bf16.msra.mxu1 %v728_v41 }
  0x81   : > { %709 = vmatprep.subr.bf16.mxu0 %v976_v0  ;;  %730 = vmatprep.subr.bf16.mxu1 %v976_v0 }
  0x84   : > { %711 = vmatpush3.bf16.msra.mxu0 %v710_v25  ;;  %732 = vmatpush3.bf16.msra.mxu1 %v731_v44 }
  0x85   : > { %712 = vmatprep.subr.bf16.mxu0 %v976_v0  ;;  %733 = vmatprep.subr.bf16.mxu1 %v976_v0 }
  0x88   : > { %714 = vmatpush3.bf16.msra.mxu0 %v713_v28  ;;  %735 = vmatpush3.bf16.msra.mxu1 %v734_v47 }
  0x89   : > { %736 = vmatprep.subr.bf16.mxu1 %v976_v0  ;;  %v582_v0 = vld [vmem:[%s1272_s4] ss:$0 sm:$0xff] }
  0x8b   : > { %654 = vmatmul.mubr.f32.vlgmr.msra.gmra.mrb[0].mxu0 %v269_v29 }
  0x8c   : > { %738 = vmatpush3.bf16.msra.mxu1 %v737_v50 }
 0x15e   : > { %v359_v52 = vpop.f32.mrb[0].mxu0 }
 0x15f   : > { %v360_v53 = vadd.f32 %v581_v51, %v359_v52  ;;  %v655_v54 = vpop.f32.mrb[1].mxu0 }
 0x161   : > { %v364_v55 = vmul.f32 %v360_v53, %v360_v53  ;;  %v363_v61 = vmul.f32 0.5, %v360_v53 }
 0x163   : > { %v365_v56 = vmul.f32 %v364_v55, %v360_v53 }
 0x165   : > { %v366_v57 = vmul.f32 0.044715, %v365_v56 }
 0x167   : > { %v367_v58 = vadd.f32 %v366_v57, %v360_v53 }
 0x169   : > { %v368_v59 = vmul.f32 0.7978846, %v367_v58 }
 0x16b   : > { %811 = vtanh.f32 %v368_v59 }
 0x175   : > { %v812_v60 = vpop.eup %811 }
 0x176   : > { %v370_v62 = vadd.f32 1.0, %v812_v60 }
 0x178   : > { %v371_v63 = vmul.f32 %v370_v62, %v363_v61 }
 0x17a   : > { %689 = vmatmul.mubr.f32.vlgmr.msra.gmra.mrb[0].mxu1 %v371_v63 }
 0x24d   : > { %v461_v1 = vpop.f32.mrb[0].mxu1 }
 0x24e   : > { %v462_v2 = vadd.f32 %v582_v0, %v461_v1  ;;  %v690_v3 = vpop.f32.mrb[1].mxu1 }
 0x250   : > { %465 = vst [vmem:[%s268_s28] sm:$0xff] %v462_v2 }
 0x251   : > { %912 = shalt.err (!%p909_p2)
}
 0x252   : > { %s913_s12 = scalar_lea.hbm %s1224_s15, 128  ;;  %s917_s26 = scalar_lea.hbm %s1273_s5, 256 }
 0x253   : > { %p914_p13 = scmp.ne.s32.totalorder %s1224_s15, %s913_s12  ;;  %p918_p4 = scmp.lt.u32.totalorder %s1224_s15, %s1273_s5 }
 0x254   : > { %p919_p5 = scmp.lt.u32.totalorder %s917_s26, %s913_s12  ;;  %p921_p11 = scmp.lt.u32.totalorder %s913_s12, %s1224_s15 }
 0x255   : > { %p915_p6 = pnand %p914_p13, %p1287_p0 }
 0x256   : > { %p920_p8 = por %p919_p5, %p918_p4 }
 0x257   : > { %p916_p10 = pneg %p915_p6 }
 0x258   : > { %p922_p1 = por %p921_p11, %p920_p8 }
 0x25a   : > { %p923_p3 = pnand %p922_p1, %p916_p10 }
 0x25c   : > { %926 = shalt.err (!%p923_p3)
}
 0x25d   : > { %749 = dma.vmem_to_hbm [thread:$0]  (%p1287_p0), %s1226_s7, 128, %s1224_s15, %s467_s16  }
 0x25e PF: > { %s492_s11 = sand.u32 1, %s957_s18   ;;  %p1288_p7 = scmp.ne.s32.totalorder %s1278_s25, 0 }
 0x25f   : > { %p1289_p9 = scmp.ge.s32.totalorder %s969_s21, 2  ;;  %s493_s28 = scalar_lea.sflag [#allocation4], %s492_s11 }
 0x261   : > { %p763_p12 = pnand %p1289_p9, %p1288_p7 }
 0x263   : > { %952 = dma.done.wait (!%p763_p12), %s493_s28, 128  }
 0x264   : > { %954 = vsyncadd (!%p763_p12), %s493_s28, 4294967168  ;;  %p19_p2 = scmp.ge.s32.totalorder %s1120_s14, 4   ;;  %s1290_s18 = smov %s961_s19 }
 0x265   : > { %s1291_s19 = smov %s965_s20  ;;  %s1292_s20 = smov %s1136_s27 }
 0x266   : > { %s1293_s21 = smov %s1120_s14  ;;  %21 = sbr.rel (!%p19_p2) target bundleno = 6 (0x6), region = 93 }
 0x26d   :  { %498 = vsyncpa [#allocation3], 1 }
 0x26e   :  { %500 = vsyncpa [#allocation3 + $0x1], 1 }
 0x26f   :  { %501 = vsyncpa [#allocation6], 1 }
 0x270   :  { %502 = vsyncpa [#allocation4], 1 }
 0x271   :  { %504 = vsyncpa [#allocation4 + $0x1], 1 }

</bundles_post_ra>
